<compile_context>
chip_gen: v5e
topology: v5e:2x2
jax: 0.10.0
libtpu: 0.0.40
codegen_flags: <defaults>
</compile_context>

<pallas_src>
import functools

import jax
import jax.numpy as jnp
from jax import lax
from jax.experimental import pallas as pl
from jax.experimental.pallas import tpu as pltpu

_LANE = 128


def _dice_partials_kernel(pred_ref, tgt_ref, inter_ref, psum_ref, cnt_ref, *,
                          s_tile, s_valid, needs_mask):
    """Accumulates per-(batch, class) partial sums over spatial tiles.

    pred_ref: (1, C, S_TILE) logits, tgt_ref: (1, 1, S_TILE) int class ids.
    inter/psum/cnt refs: (1, C, 1) f32 resident accumulators.
    """
    s = pl.program_id(1)

    @pl.when(s == 0)
    def _init():
        inter_ref[...] = jnp.zeros_like(inter_ref)
        psum_ref[...] = jnp.zeros_like(psum_ref)
        cnt_ref[...] = jnp.zeros_like(cnt_ref)

    logits = pred_ref[...].astype(jnp.float32)          # (1, C, S_TILE)
    tgt = tgt_ref[...].astype(jnp.int32)                # (1, 1, S_TILE)

    # Numerically stable softmax over the channel (sublane) axis, fused.
    m = jnp.max(logits, axis=1, keepdims=True)          # (1, 1, S_TILE)
    e = jnp.exp(logits - m)                             # (1, C, S_TILE)
    denom = jnp.sum(e, axis=1, keepdims=True)           # (1, 1, S_TILE)
    probs = e * pl.reciprocal(denom, approx=False)      # (1, C, S_TILE)

    # One-hot via a minimal (1, C, 1) class iota broadcast against targets.
    C = logits.shape[1]
    cls = lax.broadcasted_iota(jnp.int32, (1, C, 1), 1)
    eq = cls == tgt                                     # (1, C, S_TILE) bool

    if needs_mask:
        lane = lax.broadcasted_iota(jnp.int32, (1, 1, s_tile), 2)
        valid = (s * s_tile + lane) < s_valid           # (1, 1, S_TILE)
        probs = jnp.where(valid, probs, 0.0)
        eq = jnp.logical_and(eq, valid)

    eq_f = eq.astype(jnp.float32)
    inter_ref[...] += jnp.sum(probs * eq_f, axis=2, keepdims=True)
    psum_ref[...] += jnp.sum(probs, axis=2, keepdims=True)
    cnt_ref[...] += jnp.sum(eq_f, axis=2, keepdims=True)


def _choose_s_tile(S, C):
    """Pick the spatial tile (multiple of 128 lanes)."""
    s_ceil = -(-S // _LANE) * _LANE
    # Target ~2 MiB of f32 logits per step so DMA amortises per-step overhead.
    target_lanes = (2 * 1024 * 1024) // (4 * max(C, 1))
    # VMEM estimate per lane: double-buffered pred + tgt inputs plus ~4 f32
    # tile-sized temporaries (logits, exp, probs, mask/eq).  Keep under ~20 MiB
    # so we stay well inside the 32 MiB scoped limit used below.
    per_lane_bytes = 4 * (2 * (C + 1) + 4 * C)
    vmem_lanes = (20 * 1024 * 1024) // per_lane_bytes
    tile = min(target_lanes, vmem_lanes, 65536)
    tile = max(_LANE, (tile // _LANE) * _LANE)
    return min(tile, s_ceil)


def dice_loss(predictions, targets, epsilon=1e-6):
    """predictions: (B, C, H, W) float logits, targets: (B, H, W) int class ids."""
    B, C, H, W = predictions.shape
    S = H * W

    s_tile = _choose_s_tile(S, C)
    num_tiles = -(-S // s_tile)
    s_pad = num_tiles * s_tile

    # Keep the caller's float dtype (bf16 inputs halve the dominant HBM
    # stream); the kernel upcasts to f32 internally.
    pred_flat = predictions.reshape(B, C, S)
    tgt_flat = targets.reshape(B, 1, S).astype(jnp.int32)
    if s_pad != S:
        pred_flat = jnp.pad(pred_flat, ((0, 0), (0, 0), (0, s_pad - S)))
        tgt_flat = jnp.pad(tgt_flat, ((0, 0), (0, 0), (0, s_pad - S)))

    kernel = functools.partial(
        _dice_partials_kernel,
        s_tile=s_tile,
        s_valid=S,
        needs_mask=(s_pad != S),
    )

    part_shape = jax.ShapeDtypeStruct((B, C, 1), jnp.float32)
    out_spec = pl.BlockSpec((1, C, 1), lambda b, s: (b, 0, 0))

    inter, psum, cnt = pl.pallas_call(
        kernel,
        out_shape=(part_shape, part_shape, part_shape),
        grid_spec=pltpu.PrefetchScalarGridSpec(
            num_scalar_prefetch=0,
            grid=(B, num_tiles),
            in_specs=[
                pl.BlockSpec((1, C, s_tile), lambda b, s: (b, 0, s)),
                pl.BlockSpec((1, 1, s_tile), lambda b, s: (b, 0, s)),
            ],
            out_specs=[out_spec, out_spec, out_spec],
        ),
        compiler_params=pltpu.CompilerParams(
            dimension_semantics=("parallel", "arbitrary"),
            vmem_limit_bytes=32 * 1024 * 1024,
        ),
    )(pred_flat, tgt_flat)

    # Final dice + mean on the tiny (B, C) partials in the wrapper (keeps the
    # kernel free of a single-scalar serialization point).
    intersection = inter[..., 0]                       # (B, C)
    union = psum[..., 0] + cnt[..., 0]                 # (B, C)
    dice_score = (2.0 * intersection + epsilon) / (union + epsilon)
    return 1.0 - jnp.mean(dice_score)


def _dice_loss_ref(predictions, targets, epsilon=1e-6):
    num_classes = predictions.shape[1]
    probs = jax.nn.softmax(predictions.astype(jnp.float32), axis=1)
    onehot = jax.nn.one_hot(targets.astype(jnp.int32), num_classes,
                            dtype=jnp.float32)         # (B, H, W, C)
    onehot = jnp.transpose(onehot, (0, 3, 1, 2))       # (B, C, H, W)
    intersection = jnp.sum(probs * onehot, axis=(2, 3))
    union = jnp.sum(probs, axis=(2, 3)) + jnp.sum(onehot, axis=(2, 3))
    dice_score = (2.0 * intersection + epsilon) / (union + epsilon)
    return 1.0 - jnp.mean(dice_score)


if __name__ == "__main__":
    key = jax.random.PRNGKey(0)
    kp, kt = jax.random.split(key)
    B, C, H, W = 2, 4, 16, 16
    predictions = jax.random.normal(kp, (B, C, H, W), dtype=jnp.float32)
    targets = jax.random.randint(kt, (B, H, W), 0, C, dtype=jnp.int32)

    loss = dice_loss(predictions, targets)
    loss = jax.block_until_ready(loss)

    ref = _dice_loss_ref(predictions, targets)
    assert jnp.allclose(loss, ref, rtol=1e-5, atol=1e-6), (loss, ref)

    print("KERNEL_OK")
</pallas_src>

<mosaic_0001>
module attributes {stable_mosaic.version = 11 : i64} {
  func.func @_dice_partials_kernel(%arg0: i32, %arg1: i32, %arg2: memref<1x4x256xf32, #tpu.memory_space<vmem>>, %arg3: memref<1x1x256xi32, #tpu.memory_space<vmem>>, %arg4: memref<1x4x1xf32, #tpu.memory_space<vmem>>, %arg5: memref<1x4x1xf32, #tpu.memory_space<vmem>>, %arg6: memref<1x4x1xf32, #tpu.memory_space<vmem>>) attributes {dimension_semantics = [#tpu.dimension_semantics<parallel>, #tpu.dimension_semantics<arbitrary>], iteration_bounds = array<i64: 2, 1>, scalar_prefetch = 0 : i64, scratch_operands = 0 : i64, tpu.core_type = #tpu.core_type<tc>, window_params = [{transform_indices = @transform_0, window_bounds = array<i64: 1, 4, 256>}, {transform_indices = @transform_1, window_bounds = array<i64: 1, 1, 256>}, {transform_indices = @transform_2, window_bounds = array<i64: 1, 4, 1>}, {transform_indices = @transform_3, window_bounds = array<i64: 1, 4, 1>}, {transform_indices = @transform_4, window_bounds = array<i64: 1, 4, 1>}]} {
    %c0_i32 = arith.constant 0 : i32
    %0 = arith.cmpi eq, %arg1, %c0_i32 : i32
    %1 = arith.extui %0 : i1 to i32
    %c0_i32_0 = arith.constant 0 : i32
    %2 = arith.cmpi ne, %1, %c0_i32_0 : i32
    scf.if %2 {
      %cst_28 = arith.constant 0.000000e+00 : f32
      %37 = vector.broadcast %cst_28 : f32 to vector<1x4x1xf32>
      %c0_29 = arith.constant 0 : index
      %c0_30 = arith.constant 0 : index
      %c0_31 = arith.constant 0 : index
      %38 = vector.load %arg4[%c0_29, %c0_30, %c0_31] : memref<1x4x1xf32, #tpu.memory_space<vmem>>, vector<1x4x1xf32>
      tpu.vector_store %arg4[%c0_29, %c0_30, %c0_31], %37 {strides = array<i32>} : memref<1x4x1xf32, #tpu.memory_space<vmem>>, vector<1x4x1xf32>,
      %cst_32 = arith.constant 0.000000e+00 : f32
      %39 = vector.broadcast %cst_32 : f32 to vector<1x4x1xf32>
      %c0_33 = arith.constant 0 : index
      %c0_34 = arith.constant 0 : index
      %c0_35 = arith.constant 0 : index
      %40 = vector.load %arg5[%c0_33, %c0_34, %c0_35] : memref<1x4x1xf32, #tpu.memory_space<vmem>>, vector<1x4x1xf32>
      tpu.vector_store %arg5[%c0_33, %c0_34, %c0_35], %39 {strides = array<i32>} : memref<1x4x1xf32, #tpu.memory_space<vmem>>, vector<1x4x1xf32>,
      %cst_36 = arith.constant 0.000000e+00 : f32
      %41 = vector.broadcast %cst_36 : f32 to vector<1x4x1xf32>
      %c0_37 = arith.constant 0 : index
      %c0_38 = arith.constant 0 : index
      %c0_39 = arith.constant 0 : index
      %42 = vector.load %arg6[%c0_37, %c0_38, %c0_39] : memref<1x4x1xf32, #tpu.memory_space<vmem>>, vector<1x4x1xf32>
      tpu.vector_store %arg6[%c0_37, %c0_38, %c0_39], %41 {strides = array<i32>} : memref<1x4x1xf32, #tpu.memory_space<vmem>>, vector<1x4x1xf32>,
    } else {
    }
    %c0 = arith.constant 0 : index
    %c0_1 = arith.constant 0 : index
    %c0_2 = arith.constant 0 : index
    %3 = vector.load %arg2[%c0, %c0_1, %c0_2] : memref<1x4x256xf32, #tpu.memory_space<vmem>>, vector<1x4x256xf32>
    %c0_3 = arith.constant 0 : index
    %c0_4 = arith.constant 0 : index
    %c0_5 = arith.constant 0 : index
    %4 = vector.load %arg3[%c0_3, %c0_4, %c0_5] : memref<1x1x256xi32, #tpu.memory_space<vmem>>, vector<1x1x256xi32>
    %cst = arith.constant dense<0xFF800000> : vector<1x256xf32>
    %5 = vector.multi_reduction <maximumf>, %3, %cst [1] : vector<1x4x256xf32> to vector<1x256xf32>
    %6 = vector.shape_cast %5 : vector<1x256xf32> to vector<1x1x256xf32>
    %7 = vector.broadcast %6 : vector<1x1x256xf32> to vector<1x4x256xf32>
    %8 = arith.subf %3, %7 : vector<1x4x256xf32>
    %9 = math.exp %8 : vector<1x4x256xf32>
    %cst_6 = arith.constant dense<0.000000e+00> : vector<1x256xf32>
    %10 = vector.multi_reduction <add>, %9, %cst_6 [1] : vector<1x4x256xf32> to vector<1x256xf32>
    %11 = vector.shape_cast %10 : vector<1x256xf32> to vector<1x1x256xf32>
    %12 = tpu.reciprocal %11 : vector<1x1x256xf32> -> vector<1x1x256xf32>
    %13 = vector.broadcast %12 : vector<1x1x256xf32> to vector<1x4x256xf32>
    %14 = arith.mulf %9, %13 : vector<1x4x256xf32>
    %15 = tpu.iota {dimensions = array<i32: 1>} : vector<1x4x1xi32>
    %16 = vector.broadcast %15 : vector<1x4x1xi32> to vector<1x4x256xi32>
    %17 = vector.broadcast %4 : vector<1x1x256xi32> to vector<1x4x256xi32>
    %18 = arith.cmpi eq, %16, %17 : vector<1x4x256xi32>
    %19 = arith.extui %18 : vector<1x4x256xi1> to vector<1x4x256xi32>
    %20 = arith.sitofp %19 : vector<1x4x256xi32> to vector<1x4x256xf32>
    %c0_7 = arith.constant 0 : index
    %c0_8 = arith.constant 0 : index
    %c0_9 = arith.constant 0 : index
    %21 = vector.load %arg4[%c0_7, %c0_8, %c0_9] : memref<1x4x1xf32, #tpu.memory_space<vmem>>, vector<1x4x1xf32>
    %22 = arith.mulf %14, %20 : vector<1x4x256xf32>
    %cst_10 = arith.constant dense<0.000000e+00> : vector<1x4xf32>
    %23 = vector.multi_reduction <add>, %22, %cst_10 [2] : vector<1x4x256xf32> to vector<1x4xf32>
    %24 = vector.shape_cast %23 : vector<1x4xf32> to vector<1x4x1xf32>
    %25 = arith.addf %21, %24 : vector<1x4x1xf32>
    %c0_11 = arith.constant 0 : index
    %c0_12 = arith.constant 0 : index
    %c0_13 = arith.constant 0 : index
    %26 = vector.load %arg4[%c0_11, %c0_12, %c0_13] : memref<1x4x1xf32, #tpu.memory_space<vmem>>, vector<1x4x1xf32>
    tpu.vector_store %arg4[%c0_11, %c0_12, %c0_13], %25 {strides = array<i32>} : memref<1x4x1xf32, #tpu.memory_space<vmem>>, vector<1x4x1xf32>,
    %c0_14 = arith.constant 0 : index
    %c0_15 = arith.constant 0 : index
    %c0_16 = arith.constant 0 : index
    %27 = vector.load %arg5[%c0_14, %c0_15, %c0_16] : memref<1x4x1xf32, #tpu.memory_space<vmem>>, vector<1x4x1xf32>
    %cst_17 = arith.constant dense<0.000000e+00> : vector<1x4xf32>
    %28 = vector.multi_reduction <add>, %14, %cst_17 [2] : vector<1x4x256xf32> to vector<1x4xf32>
    %29 = vector.shape_cast %28 : vector<1x4xf32> to vector<1x4x1xf32>
    %30 = arith.addf %27, %29 : vector<1x4x1xf32>
    %c0_18 = arith.constant 0 : index
    %c0_19 = arith.constant 0 : index
    %c0_20 = arith.constant 0 : index
    %31 = vector.load %arg5[%c0_18, %c0_19, %c0_20] : memref<1x4x1xf32, #tpu.memory_space<vmem>>, vector<1x4x1xf32>
    tpu.vector_store %arg5[%c0_18, %c0_19, %c0_20], %30 {strides = array<i32>} : memref<1x4x1xf32, #tpu.memory_space<vmem>>, vector<1x4x1xf32>,
    %c0_21 = arith.constant 0 : index
    %c0_22 = arith.constant 0 : index
    %c0_23 = arith.constant 0 : index
    %32 = vector.load %arg6[%c0_21, %c0_22, %c0_23] : memref<1x4x1xf32, #tpu.memory_space<vmem>>, vector<1x4x1xf32>
    %cst_24 = arith.constant dense<0.000000e+00> : vector<1x4xf32>
    %33 = vector.multi_reduction <add>, %20, %cst_24 [2] : vector<1x4x256xf32> to vector<1x4xf32>
    %34 = vector.shape_cast %33 : vector<1x4xf32> to vector<1x4x1xf32>
    %35 = arith.addf %32, %34 : vector<1x4x1xf32>
    %c0_25 = arith.constant 0 : index
    %c0_26 = arith.constant 0 : index
    %c0_27 = arith.constant 0 : index
    %36 = vector.load %arg6[%c0_25, %c0_26, %c0_27] : memref<1x4x1xf32, #tpu.memory_space<vmem>>, vector<1x4x1xf32>
    tpu.vector_store %arg6[%c0_25, %c0_26, %c0_27], %35 {strides = array<i32>} : memref<1x4x1xf32, #tpu.memory_space<vmem>>, vector<1x4x1xf32>,
    return
  }
  func.func @transform_0(%arg0: i32, %arg1: i32) -> (i32, i32, i32) {
    %c0_i32 = arith.constant 0 : i32
    %c0_i32_0 = arith.constant 0 : i32
    return %arg0, %c0_i32, %arg1 : i32, i32, i32
  }
  func.func @transform_1(%arg0: i32, %arg1: i32) -> (i32, i32, i32) {
    %c0_i32 = arith.constant 0 : i32
    %c0_i32_0 = arith.constant 0 : i32
    return %arg0, %c0_i32, %arg1 : i32, i32, i32
  }
  func.func @transform_2(%arg0: i32, %arg1: i32) -> (i32, i32, i32) {
    %c0_i32 = arith.constant 0 : i32
    %c0_i32_0 = arith.constant 0 : i32
    %c0_i32_1 = arith.constant 0 : i32
    return %arg0, %c0_i32, %c0_i32_0 : i32, i32, i32
  }
  func.func @transform_3(%arg0: i32, %arg1: i32) -> (i32, i32, i32) {
    %c0_i32 = arith.constant 0 : i32
    %c0_i32_0 = arith.constant 0 : i32
    %c0_i32_1 = arith.constant 0 : i32
    return %arg0, %c0_i32, %c0_i32_0 : i32, i32, i32
  }
  func.func @transform_4(%arg0: i32, %arg1: i32) -> (i32, i32, i32) {
    %c0_i32 = arith.constant 0 : i32
    %c0_i32_0 = arith.constant 0 : i32
    %c0_i32_1 = arith.constant 0 : i32
    return %arg0, %c0_i32, %c0_i32_0 : i32, i32, i32
  }
}

</mosaic_0001>

<bundles_post_ra>
// kernel: tpu_custom_call.1
= control target key start
LH: loop header
LB: loop body
LE: loop exit
PB: predicated region body
PF: predicated region fallthrough
CT: control target
= control target key end

     0   :  { %10 = vsyncpa [#allocation3], 0  ;;  %s982_s0 = inlined_call_operand.hbm [shape: f32[2,4,256], index: 0, kind: input, shape index: {}]   ;;  %s983_s1 = inlined_call_operand.hbm [shape: s32[2,1,256], index: 1, kind: input, shape index: {}]   ;;  %s984_s2 = inlined_call_operand.vmem [shape: f32[2,4,1], index: 2, kind: output, shape index: {0}]   ;;  %s985_s3 = inlined_call_operand.vmem [shape: f32[2,4,1], index: 3, kind: output, shape index: {1}]   ;;  %s986_s4 = inlined_call_operand.vmem [shape: f32[2,4,1], index: 4, kind: output, shape index: {2}]  }
   0x1   :  { %12 = vsyncpa [#allocation3 + $0x1], 0 }
   0x2   :  { %13 = vsyncpa [#allocation5], 0 }
   0x3   :  { %15 = vsyncpa [#allocation5 + $0x1], 0  ;;  %s836_s15 = smov 0   ;;  %s838_s16 = smov 0  }
   0x4   :  { %s840_s17 = smov 0   ;;  %s842_s18 = smov 0  }
   0x5   :  { %s844_s19 = smov 0   ;;  %s846_s20 = smov 0  }
   0x6 LB: > { %s607_s21 = sadd.s32 4294967295, %s808_s20   ;;  %s33_s22 = sadd.s32 1, %s804_s19  ;;  %s808_s20 = sphi %s846_s20, %s21_s20   ;;  %s804_s19 = sphi %s844_s19, %s994_s19   ;;  %s800_s18 = sphi %s842_s18, %s993_s18   ;;  %s796_s17 = sphi %s840_s17, %s992_s17   ;;  %s792_s16 = sphi %s838_s16, %s991_s16   ;;  %s788_s15 = sphi %s836_s15, %s990_s15  }
   0x7   : > { %p35_p0 = scmp.ge.s32.totalorder %s33_s22, 2  ;;  %s42_s23 = sadd.s32 1, %s796_s17 }
   0x8   : > { %p49_p1 = scmp.ne.s32.totalorder %s796_s17, %s792_s16  ;;  %p50_p2 = scmp.eq.s32.totalorder %s808_s20, 0 }
   0x9   : > { %s996_s22 = smov (%p35_p0, %s33_s22), 0  ;;  %p55_p4 = scmp.ne.s32.totalorder %s792_s16, %s788_s15 }
   0xa   : > { %p872_p3 = por %p50_p2, %p49_p1  ;;  %s37_s25 = ssub.s32 %s804_s19, %s996_s22 }
   0xb   : > { %p56_p5 = scmp.eq.s32.totalorder %s607_s21, 0  ;;  %p40_p6 = scmp.eq.s32.totalorder %s37_s25, 0 }
   0xc   : > { %p638_p8 = scmp.lt.s32.totalorder %s808_s20, 2  ;;  %s185_s28 = sand.u32 1, %s796_s17  }
   0xd   : > { %p879_p7 = por %p56_p5, %p55_p4  ;;  %s626_s29 = sshll.u32 %s804_s19, 3 }
   0xe   : > { %s885_s27 = scalar_select %p40_p6, %s796_s17, %s42_s23  }
   0xf   : > { %s611_s30 = sshll.u32 %s185_s28, 3  ;;  %s196_s7 = scalar_lea.hbm %s982_s0, %s626_s29 }
  0x10   : > { %s198_s8 = sshll.u32 %s196_s7, 4  ;;  %s189_s9 = scalar_lea.vmem [#allocation2], %s611_s30  ;;  %s199_s8 = int_to_ptr.hbm [resolvable:$true] %s198_s8 }
  0x11   : > { %s200_s10 = sshll.u32 %s189_s9, 4  ;;  %p894_p9 = pnand %p638_p8, %p872_p3  ;;  %s201_s10 = int_to_ptr.vmem [resolvable:$true] %s200_s10 }
  0x12   : > { %p616_p10 = scmp.ge.s32.totalorder %s808_s20, 1  ;;  %p226_p11 = scmp.lt.s32.totalorder %s808_s20, 3 }
  0x13   : > { %s614_s12 = sshll.u32 %s185_s28, 1  ;;  %s186_s13 = scalar_lea.sflag [#allocation3], %s185_s28 }
  0x14   : > { %634 = dma.hbm_to_vmem [thread:$0]  (!%p894_p9), %s199_s8, 128, %s201_s10, %s186_s13  }
  0x15   : > { %p227_p12 = pnand %p616_p10, %p226_p11  ;;  %s615_s14 = sshll.u32 %s804_s19, 1 }
  0x16   : > { %s211_s15 = scalar_lea.vmem [#allocation4], %s614_s12  ;;  %s217_s24 = scalar_lea.hbm %s983_s1, %s615_s14 }
  0x17   : > { %s221_s21 = sshll.u32 %s211_s15, 4  ;;  %s219_s29 = sshll.u32 %s217_s24, 4  ;;  %s222_s21 = int_to_ptr.vmem [resolvable:$true] %s221_s21  ;;  %s220_s29 = int_to_ptr.hbm [resolvable:$true] %s219_s29 }
  0x18   : > { %s208_s30 = scalar_lea.sflag [#allocation5], %s185_s28  ;;  %230 = sbr.rel (%p227_p12) target bundleno = 253 (0xfd), region = 28 }
  0x19   : > { %637 = dma.hbm_to_vmem [thread:$0]  (!%p894_p9), %s220_s29, 32, %s222_s21, %s208_s30  }
  0x1a   : > { %s232_s5 = sand.u32 (!%p227_p12), 1, %s792_s16  }
  0x1b   : > { %s617_s6 = sshll.u32 (!%p227_p12), %s232_s5, 3  ;;  %s233_s7 = scalar_lea.sflag (!%p227_p12), [#allocation3], %s232_s5 }
  0x1c   : > { %s236_s8 = scalar_lea.vmem (!%p227_p12), [#allocation2], %s617_s6 }
  0x1d   : > { %779 = dma.done.wait (%p879_p7), %s233_s7, 128  }
  0x1e   : > { %781 = vsyncadd (%p879_p7), %s233_s7, 4294967168  ;;  %s618_s9 = sshll.u32 %s232_s5, 1  ;;  %s243_s10 = scalar_lea.sflag [#allocation5], %s232_s5 }
  0x1f   : > { %s913_s12 = scalar_lea.vmem [#allocation4], %s618_s9 }
  0x20   : > { %783 = dma.done.wait (%p879_p7), %s243_s10, 32  }
  0x21   : > { %785 = vsyncadd (%p879_p7), %s243_s10, 4294967264  ;;  %v306_v0 = vld [vmem:[%s236_s8] sm:$0xff]  ;;  %vm314_vm0 = vcmask 1043456   ;;  %v391_v30 = vlaneseq  ;;  %v307_v33 = vld [vmem:[%s913_s12] sm:$0x3]  ;;  %p286_p13 = scmp.lt.s32.totalorder %s800_s18, 1 }
  0x22   : > { %309 = vst [vmem:[#allocation1] ss:$2 sm:$0xff] %v306_v0  ;;  %v393_v39 = vperm.slane %v307_v33, 0  ;;  %v394_v40 = vperm.slane %v307_v33, 1  ;;  %v810_v43 = vmov 0.0   ;;  %vm302_vm8 = vcmask 3072  }
  0x23   : > { %v392_v36 = vshrl.u32 %v391_v30, 7  ;;  %s998_s18 = smov (!%p286_p13, %s800_s18), 1 }
  0x24   : > { %s932_s26 = sshll.u32 %s998_s18, 2 }
  0x25   : > { %vm395_vm1 = vcmp.eq.s32.totalorder %v392_v36, %v393_v39  ;;  %vm396_vm2 = vcmp.eq.s32.totalorder %v392_v36, %v394_v40  ;;  %s938_s13 = scalar_lea.vmem %s984_s2, %s932_s26  ;;  %s297_s15 = scalar_lea.vmem %s986_s4, %s932_s26 }
  0x26   : > { %v622_v44 = vsel %vm395_vm1, 1.0, %v810_v43  ;;  %v623_v45 = vsel %vm396_vm2, 1.0, %v810_v43  ;;  %303 = vst.msk [vmem:[%s938_s13] sm:$0xf] %vm302_vm8, %v810_v43  ;;  %s293_s25 = scalar_lea.vmem %s985_s3, %s932_s26 }
  0x27   : > { %v437_v46 = vsel %vm314_vm0, %v622_v44, 0.0  ;;  %v438_v47 = vsel %vm314_vm0, %v623_v45, 0.0  ;;  %305 = vst.msk [vmem:[%s297_s15] sm:$0xf] %vm302_vm8, %v810_v43 }
  0x28   : > { %v439_v48 = vadd.f32 %v438_v47, %v437_v46  ;;  %304 = vst.msk [vmem:[%s293_s25] sm:$0xf] %vm302_vm8, %v810_v43 }
  0x29   : > { %v310_v1 = vld.sshfl [vmem:[#allocation1] sm:$0xff pattern:$0x75316420]  ;;  %v311_v2 = vld.sshfl [vmem:[#allocation1 + $0x8] sm:$0xff pattern:$0x75316420] }
  0x2a   : > { %v315_v3 = vsel %vm314_vm0, %v310_v1, -inf  ;;  %v322_v4 = vsel %vm314_vm0, %v311_v2, -inf  ;;  %440 = vadd.xlane.f32.xlu1 %v439_v48 }
  0x2b   : > { %v316_v5 = vrot.slane %v315_v3, 4  ;;  %v323_v6 = vrot.slane %v322_v4, 4 }
  0x2d   : > { %v317_v7 = vmax.f32 %v315_v3, %v316_v5  ;;  %v324_v8 = vmax.f32 %v322_v4, %v323_v6  ;;  %v404_v3 = vrot.slane %v623_v45, 4 }
  0x2f   : > { %v318_v9 = vrot.slane %v317_v7, 2  ;;  %v325_v10 = vrot.slane %v324_v8, 2 }
  0x31   : > { %v319_v11 = vmax.f32 %v317_v7, %v318_v9  ;;  %v326_v12 = vmax.f32 %v324_v8, %v325_v10  ;;  %v405_v8 = vsel %vm314_vm0, %v622_v44, %v404_v3 }
  0x33   : > { %v320_v13 = vrot.slane %v319_v11, 1  ;;  %v327_v14 = vrot.slane %v326_v12, 1 }
  0x35   : > { %v321_v15 = vmax.f32 %v319_v11, %v320_v13  ;;  %v328_v16 = vmax.f32 %v326_v12, %v327_v14 }
  0x37   : > { %v331_v17 = vrot.slane %v328_v16, 4 }
  0x39   : > { %v332_v18 = vsel %vm314_vm0, %v321_v15, %v331_v17 }
  0x3a   : > { %v334_v19 = vsub.f32 %v306_v0, %v332_v18 }
  0x3c   : > { %v335_v20 = vmul.f32 1.442695, %v334_v19 }
  0x3e   : > { %688 = vpow2.f32 %v335_v20 }
  0x44   : > { %v922_v21 = vpop.eup %688 }
  0x45   : > { %338 = vst [vmem:[#allocation1] ss:$2 sm:$0xff] %v922_v21 }
  0x4c   : > { %v339_v22 = vld.sshfl [vmem:[#allocation1] sm:$0xff pattern:$0x75316420]  ;;  %v340_v23 = vld.sshfl [vmem:[#allocation1 + $0x8] sm:$0xff pattern:$0x75316420] }
  0x4d   : > { %v343_v24 = vsel %vm314_vm0, %v339_v22, 0.0  ;;  %v350_v25 = vsel %vm314_vm0, %v340_v23, 0.0  ;;  %v436_v22 = vld [vmem:[%s297_s15] sm:$0xf] }
  0x4e   : > { %v344_v26 = vrot.slane %v343_v24, 4  ;;  %v351_v27 = vrot.slane %v350_v25, 4 }
  0x50   : > { %v345_v28 = vadd.f32 %v344_v26, %v343_v24  ;;  %v352_v29 = vadd.f32 %v351_v27, %v350_v25  ;;  %v401_v24 = vld [vmem:[%s938_s13] sm:$0xf] }
  0x51   : > { %v422_v27 = vld [vmem:[%s293_s25] sm:$0xf] }
  0x52   : > { %v346_v31 = vrot.slane %v345_v28, 2  ;;  %v353_v32 = vrot.slane %v352_v29, 2 }
  0x54   : > { %v347_v34 = vadd.f32 %v346_v31, %v345_v28  ;;  %v354_v35 = vadd.f32 %v353_v32, %v352_v29 }
  0x56   : > { %v348_v37 = vrot.slane %v347_v34, 1  ;;  %v355_v38 = vrot.slane %v354_v35, 1 }
  0x58   : > { %v349_v41 = vadd.f32 %v348_v37, %v347_v34  ;;  %v356_v42 = vadd.f32 %v355_v38, %v354_v35 }
  0x5a   : > { %690 = vrcp.f32 %v349_v41  ;;  %vm362_vm3 = vweird.f32 %v349_v41  ;;  %v366_v52 = vand.u32 2147483647, %v349_v41  ;;  %v368_v55 = vand.u32 2147483648, %v349_v41 }
  0x5b   : > { %692 = vrcp.f32 %v356_v42  ;;  %v382_v56 = vand.u32 2147483648, %v356_v42  ;;  %vm376_vm5 = vweird.f32 %v356_v42  ;;  %v380_v58 = vand.u32 2147483647, %v356_v42 }
  0x5c   : > { %v369_v62 = vor.u32 1.1754944e-38, %v368_v55  ;;  %vm367_vm10 = vcmp.eq.f32.partialorder %v366_v52, 8.507059e+37 }
  0x5d   : > { %v383_v63 = vor.u32 1.1754944e-38, %v382_v56  ;;  %vm381_vm11 = vcmp.eq.f32.partialorder %v380_v58, 8.507059e+37 }
  0x60   : > { %v691_v49 = vpop.eup %690 }
  0x61   : > { %v693_v50 = vpop.eup %692  ;;  %v358_v51 = vmul.f32 %v691_v49, %v349_v41  ;;  %vm363_vm4 = vweird.f32 %v691_v49 }
  0x62   : > { %v372_v53 = vmul.f32 %v693_v50, %v356_v42  ;;  %vm377_vm6 = vweird.f32 %v693_v50  ;;  %vm364_vm7 = vmor %vm362_vm3, %vm363_vm4 }
  0x63   : > { %v359_v54 = vsub.f32 1.0, %v358_v51  ;;  %vm378_vm9 = vmor %vm376_vm5, %vm377_vm6 }
  0x64   : > { %v373_v57 = vsub.f32 1.0, %v372_v53 }
  0x65   : > { %v360_v59 = vmul.f32 %v691_v49, %v359_v54 }
  0x66   : > { %v374_v60 = vmul.f32 %v693_v50, %v373_v57 }
  0x67   : > { %v361_v61 = vadd.f32 %v691_v49, %v360_v59 }
  0x68   : > { %v375_v0 = vadd.f32 %v693_v50, %v374_v60 }
  0x69   : > { %v365_v1 = vsel %vm364_vm7, %v691_v49, %v361_v61 }
  0x6a   : > { %v379_v2 = vsel %vm378_vm9, %v693_v50, %v375_v0  ;;  %v370_v4 = vsel %vm367_vm10, %v369_v62, %v365_v1 }
  0x6b   : > { %v384_v5 = vsel %vm381_vm11, %v383_v63, %v379_v2 }
  0x6c   : > { %v387_v6 = vrot.slane %v384_v5, 4 }
  0x6e   : > { %v388_v7 = vsel %vm314_vm0, %v370_v4, %v387_v6 }
  0x6f   : > { %v390_v9 = vmul.f32 %v922_v21, %v388_v7 }
  0x71   : > { %v407_v10 = vmul.f32 %v405_v8, %v390_v9 }
  0x73   : > { %409 = vst [vmem:[#allocation1] ss:$2 sm:$0xff] %v407_v10 }
  0x7a   : > { %v410_v11 = vld.sshfl [vmem:[#allocation1] sm:$0xff pattern:$0x75316420]  ;;  %v411_v12 = vld.sshfl [vmem:[#allocation1 + $0x8] sm:$0xff pattern:$0x75316420] }
  0x7b   : > { %v414_v13 = vsel %vm314_vm0, %v410_v11, 0.0  ;;  %v415_v14 = vsel %vm314_vm0, %v411_v12, 0.0  ;;  %424 = vst [vmem:[#allocation1] ss:$2 sm:$0xff] %v390_v9 }
  0x7c   : > { %v416_v15 = vadd.f32 %v415_v14, %v414_v13 }
  0x7e   : > { %417 = vadd.xlane.f32.xlu0 %v416_v15 }
  0x82   : > { %v425_v16 = vld.sshfl [vmem:[#allocation1] sm:$0xff pattern:$0x75316420]  ;;  %v426_v17 = vld.sshfl [vmem:[#allocation1 + $0x8] sm:$0xff pattern:$0x75316420] }
  0x83   : > { %v429_v18 = vsel %vm314_vm0, %v425_v16, 0.0  ;;  %v430_v19 = vsel %vm314_vm0, %v426_v17, 0.0 }
  0x84   : > { %v431_v20 = vadd.f32 %v430_v19, %v429_v18 }
  0x86   : > { %432 = vadd.xlane.f32.xlu0 %v431_v20 }
  0x9d   : > { %v441_v21 = vpop.xlane.xlu1 %440 }
  0x9e   : > { %v442_v23 = vadd.f32 %v441_v21, %v436_v22 }
  0xa0   : > { %443 = vst.msk [vmem:[%s297_s15] sm:$0xf] %vm302_vm8, %v442_v23 }
  0xf1   : > { %v418_v25 = vpop.xlane.xlu0 %417 }
  0xf2   : > { %v419_v26 = vadd.f32 %v418_v25, %v401_v24 }
  0xf4   : > { %421 = vst.msk [vmem:[%s938_s13] sm:$0xf] %vm302_vm8, %v419_v26 }
  0xf9   : > { %v433_v28 = vpop.xlane.xlu0 %432 }
  0xfa   : > { %v434_v29 = vadd.f32 %v433_v28, %v422_v27 }
  0xfc   : > { %435 = vst.msk [vmem:[%s293_s25] sm:$0xf] %vm302_vm8, %v434_v29 }
  0xfd PF: > { %s21_s20 = sadd.s32 1, %s808_s20   ;;  %s990_s15 = smov %s792_s16 }
  0xfe   : > { %p18_p0 = scmp.ge.s32.totalorder %s21_s20, 4   ;;  %s991_s16 = smov %s796_s17 }
  0xff   : > { %s992_s17 = smov %s885_s27  ;;  %s993_s18 = smov %s804_s19 }
 0x100   : > { %s994_s19 = smov %s996_s22  ;;  %20 = sbr.rel (!%p18_p0) target bundleno = 6 (0x6), region = 109 }
 0x105   :  { %491 = vsyncpa [#allocation3], 1 }
 0x106   :  { %493 = vsyncpa [#allocation3 + $0x1], 1 }
 0x107   :  { %494 = vsyncpa [#allocation5], 1 }
 0x108   :  { %496 = vsyncpa [#allocation5 + $0x1], 1 }

</bundles_post_ra>
